<compile_context>
chip_gen: v6e
topology: v6e:2x2x1
jax: 0.10.0
libtpu: 0.0.40
codegen_flags: <defaults>
</compile_context>

<pallas_src>
import functools

import jax
import jax.numpy as jnp
import numpy as np
from jax import lax
from jax.experimental import pallas as pl
from jax.experimental.pallas import tpu as pltpu


def _lstm_cell(gates, c, g_mask):
    """gates: (B, 4H) pre-activations whose g-gate block was pre-scaled by 2.

    One full-width sigmoid (single EUP pass over the whole (B, 4H) block)
    replaces 3 narrow sigmoids + 1 narrow tanh; tanh(z) on the g lanes is
    recovered as 2*sigmoid(2z) - 1 via a constant lane mask (cheap VPU select).
    """
    H = c.shape[-1]
    s = jax.nn.sigmoid(gates)
    act = jnp.where(g_mask, 2.0 * s - 1.0, s)
    i_g = act[:, 0 * H:1 * H]
    f_g = act[:, 1 * H:2 * H]
    g_g = act[:, 2 * H:3 * H]
    o_g = act[:, 3 * H:4 * H]
    c_new = f_g * c + i_g * g_g
    h_new = o_g * jnp.tanh(c_new)
    return h_new, c_new


def lstm_linear_kernel(x_ref, wih_ref, whh_ref, b_ref, wlin_ref, blin_ref,
                       y_ref, out_ref, *scratch, T, B, unroll):
    H = whh_ref.shape[0]

    # ---- Phase 1: time-parallel input projection (one big MXU matmul) ----
    gx = jnp.dot(x_ref[...], wih_ref[...],
                 preferred_element_type=jnp.float32) + b_ref[...]

    whh = whh_ref[...]        # hoist loop-invariant weight loads
    wlin = wlin_ref[...]
    blin = blin_ref[...]
    # TODO(synk): at scale, keep W_hh resident in the MXU across time steps via
    # pltpu.matmul_push_rhs / matmul_acc_lhs / matmul_pop (at small B the
    # per-step RHS re-push dominates the MXU cost of the recurrence).

    col = lax.broadcasted_iota(jnp.int32, (B, 4 * H), 1)
    g_mask = (col >= 2 * H) & (col < 3 * H)      # constant lane mask, hoisted

    h = jnp.zeros((B, H), jnp.float32)
    c = jnp.zeros((B, H), jnp.float32)

    if unroll:
        # Short-T path: fully unrolled. gx stays in vregs (no VMEM scratch
        # round trip), every slice/store is static, and the output Linear is
        # fused into the step so its matmul hides under the recurrence.
        for t in range(T):
            gates = gx[t * B:(t + 1) * B, :] + jnp.dot(
                h, whh, preferred_element_type=jnp.float32)
            h, c = _lstm_cell(gates, c, g_mask)
            out_ref[t * B:(t + 1) * B, :] = h
            y_ref[t * B:(t + 1) * B, :] = (
                jnp.dot(h, wlin, preferred_element_type=jnp.float32) + blin)
            # NOTE: at H>=128 these per-step stores become lane-dense (no
            # masked vst); at H=32 they are masked but tiny.
    else:
        # Long-T fallback: stage gx / h through VMEM scratch, serial fori_loop,
        # output Linear as one big (T*B, H) @ (H, O) matmul at the end.
        gx_sc, h_sc = scratch
        gx_sc[...] = gx.reshape(T, B, 4 * H)

        def step(t, carry):
            h, c = carry
            gates = gx_sc[t] + jnp.dot(h, whh, preferred_element_type=jnp.float32)
            h, c = _lstm_cell(gates, c, g_mask)
            h_sc[t] = h
            return (h, c)

        lax.fori_loop(0, T, step, (h, c))
        out_all = h_sc[...].reshape(T * B, H)
        out_ref[...] = out_all
        y_ref[...] = jnp.dot(out_all, wlin,
                             preferred_element_type=jnp.float32) + blin


def net_forward(x, w_ih, w_hh, b_ih, b_hh, w_lin, b_lin):
    """x: (T, B, I). Weights in PyTorch layout:
       w_ih (4H, I), w_hh (4H, H), b_ih (4H,), b_hh (4H,), w_lin (O, H), b_lin (O,)."""
    T, B, I = x.shape
    H = w_hh.shape[1]
    O = w_lin.shape[0]
    f32 = jnp.float32

    # Fold the two LSTM biases once; transpose weights to (in, out) so kernel
    # matmuls are plain row-major A @ B.
    wih_t = jnp.asarray(w_ih, f32).T                      # (I, 4H)
    whh_t = jnp.asarray(w_hh, f32).T                      # (H, 4H)
    b = (jnp.asarray(b_ih, f32) + jnp.asarray(b_hh, f32)).reshape(1, 4 * H)

    # Pre-scale the g-gate columns by 2 so ONE full-width sigmoid covers all
    # four gates in-kernel (tanh(z) = 2*sigmoid(2z) - 1 on the g lanes).
    gscale = jnp.concatenate([jnp.ones((2 * H,), f32),
                              jnp.full((H,), 2.0, f32),
                              jnp.ones((H,), f32)]).reshape(1, 4 * H)
    wih_t = wih_t * gscale
    whh_t = whh_t * gscale
    b = b * gscale

    wlin_t = jnp.asarray(w_lin, f32).T                    # (H, O)
    blin = jnp.asarray(b_lin, f32).reshape(1, O)
    # TODO(synk): at H>=128 cast the time-parallel MXU operands to bf16 (f32
    # accumulate) on v6e/v7x, shard B over the two v7x TensorCores, raise
    # vmem_limit_bytes on v5e, and T-chunk Phase 1/3 if gx outgrows VMEM.

    # Flatten (T, B, *) <-> (T*B, *) in the wrapper: free XLA layout plumbing,
    # keeps every kernel ref 2D and avoids in-kernel relayout copies.
    x2 = jnp.asarray(x, f32).reshape(T * B, I)

    unroll = T <= 32
    kernel = functools.partial(lstm_linear_kernel, T=T, B=B, unroll=unroll)
    vmem = pltpu.MemorySpace.VMEM
    scratch_shapes = [] if unroll else [pltpu.VMEM((T, B, 4 * H), f32),
                                        pltpu.VMEM((T, B, H), f32)]

    # No grid: the whole problem is VMEM-resident, so we skip the pipeline
    # machinery (no operand double-buffering, no per-step launch overhead).
    y2, out2 = pl.pallas_call(
        kernel,
        out_shape=(jax.ShapeDtypeStruct((T * B, O), f32),
                   jax.ShapeDtypeStruct((T * B, H), f32)),
        in_specs=[pl.BlockSpec(memory_space=vmem)] * 6,
        out_specs=(pl.BlockSpec(memory_space=vmem),
                   pl.BlockSpec(memory_space=vmem)),
        scratch_shapes=scratch_shapes,
    )(x2, wih_t, whh_t, b, wlin_t, blin)

    return y2.reshape(T, B, O), out2.reshape(T, B, H)


def net_forward_ref(x, w_ih, w_hh, b_ih, b_hh, w_lin, b_lin):
    """Pure-JAX reference (matches torch.nn.LSTM + Linear semantics)."""
    T, B, I = x.shape
    H = w_hh.shape[1]

    def step(carry, x_t):
        h, c = carry
        gates = x_t @ w_ih.T + b_ih + h @ w_hh.T + b_hh
        i_g = jax.nn.sigmoid(gates[:, 0 * H:1 * H])
        f_g = jax.nn.sigmoid(gates[:, 1 * H:2 * H])
        g_g = jnp.tanh(gates[:, 2 * H:3 * H])
        o_g = jax.nn.sigmoid(gates[:, 3 * H:4 * H])
        c_new = f_g * c + i_g * g_g
        h_new = o_g * jnp.tanh(c_new)
        return (h_new, c_new), h_new

    h0 = jnp.zeros((B, H), jnp.float32)
    (_, _), out = jax.lax.scan(step, (h0, h0), x)
    y = out @ w_lin.T + b_lin
    return y, out


if __name__ == "__main__":
    # Small shapes: seq=8, batch=4, input_size=16, hidden_size=32, output_size=8
    T, B, I, H, O = 8, 4, 16, 32, 8

    key = jax.random.PRNGKey(0)
    ks = jax.random.split(key, 7)
    k = 1.0 / np.sqrt(H)  # PyTorch default init scale for LSTM/Linear
    w_ih = jax.random.uniform(ks[0], (4 * H, I), jnp.float32, -k, k)
    w_hh = jax.random.uniform(ks[1], (4 * H, H), jnp.float32, -k, k)
    b_ih = jax.random.uniform(ks[2], (4 * H,), jnp.float32, -k, k)
    b_hh = jax.random.uniform(ks[3], (4 * H,), jnp.float32, -k, k)
    w_lin = jax.random.uniform(ks[4], (O, H), jnp.float32, -k, k)
    b_lin = jax.random.uniform(ks[5], (O,), jnp.float32, -k, k)
    x = jax.random.normal(ks[6], (T, B, I), jnp.float32)

    y, out = net_forward(x, w_ih, w_hh, b_ih, b_hh, w_lin, b_lin)
    jax.block_until_ready((y, out))

    y_ref, out_ref = net_forward_ref(x, w_ih, w_hh, b_ih, b_hh, w_lin, b_lin)
    np.testing.assert_allclose(np.asarray(out), np.asarray(out_ref), atol=1e-5, rtol=1e-5)
    np.testing.assert_allclose(np.asarray(y), np.asarray(y_ref), atol=1e-5, rtol=1e-5)

    print("KERNEL_OK")
</pallas_src>

<mosaic_0001>
module attributes {stable_mosaic.version = 11 : i64} {
  func.func @lstm_linear_kernel(%arg0: memref<32x16xf32, #tpu.memory_space<vmem>>, %arg1: memref<16x128xf32, #tpu.memory_space<vmem>>, %arg2: memref<32x128xf32, #tpu.memory_space<vmem>>, %arg3: memref<1x128xf32, #tpu.memory_space<vmem>>, %arg4: memref<32x8xf32, #tpu.memory_space<vmem>>, %arg5: memref<1x8xf32, #tpu.memory_space<vmem>>, %arg6: memref<32x8xf32, #tpu.memory_space<vmem>>, %arg7: memref<32x32xf32, #tpu.memory_space<vmem>>) attributes {dimension_semantics = [], scalar_prefetch = 0 : i64, scratch_operands = 0 : i64, tpu.core_type = #tpu.core_type<tc>} {
    %c0 = arith.constant 0 : index
    %c0_0 = arith.constant 0 : index
    %0 = vector.load %arg0[%c0, %c0_0] : memref<32x16xf32, #tpu.memory_space<vmem>>, vector<32x16xf32>
    %c0_1 = arith.constant 0 : index
    %c0_2 = arith.constant 0 : index
    %1 = vector.load %arg1[%c0_1, %c0_2] : memref<16x128xf32, #tpu.memory_space<vmem>>, vector<16x128xf32>
    %cst = arith.constant dense<0.000000e+00> : vector<32x128xf32>
    %2 = tpu.matmul %0, %1, %cst {dimension_numbers = #tpu.dot_dimension_numbers<[1], [0], [0], [1], [0, 0, 1, 1], [], []>} : vector<32x16xf32>, vector<16x128xf32>, vector<32x128xf32> -> vector<32x128xf32>
    %c0_3 = arith.constant 0 : index
    %c0_4 = arith.constant 0 : index
    %3 = vector.load %arg3[%c0_3, %c0_4] : memref<1x128xf32, #tpu.memory_space<vmem>>, vector<1x128xf32>
    %4 = vector.broadcast %3 : vector<1x128xf32> to vector<32x128xf32>
    %5 = arith.addf %2, %4 : vector<32x128xf32>
    %c0_5 = arith.constant 0 : index
    %c0_6 = arith.constant 0 : index
    %6 = vector.load %arg2[%c0_5, %c0_6] : memref<32x128xf32, #tpu.memory_space<vmem>>, vector<32x128xf32>
    %c0_7 = arith.constant 0 : index
    %c0_8 = arith.constant 0 : index
    %7 = vector.load %arg4[%c0_7, %c0_8] : memref<32x8xf32, #tpu.memory_space<vmem>>, vector<32x8xf32>
    %c0_9 = arith.constant 0 : index
    %c0_10 = arith.constant 0 : index
    %8 = vector.load %arg5[%c0_9, %c0_10] : memref<1x8xf32, #tpu.memory_space<vmem>>, vector<1x8xf32>
    %9 = tpu.iota {dimensions = array<i32: 1>} : vector<4x128xi32>
    %c64_i32 = arith.constant 64 : i32
    %10 = vector.broadcast %c64_i32 : i32 to vector<4x128xi32>
    %11 = arith.cmpi sge, %9, %10 : vector<4x128xi32>
    %c96_i32 = arith.constant 96 : i32
    %12 = vector.broadcast %c96_i32 : i32 to vector<4x128xi32>
    %13 = arith.cmpi slt, %9, %12 : vector<4x128xi32>
    %14 = arith.andi %11, %13 : vector<4x128xi1>
    %cst_11 = arith.constant 0.000000e+00 : f32
    %15 = vector.broadcast %cst_11 : f32 to vector<4x32xf32>
    %cst_12 = arith.constant 0.000000e+00 : f32
    %16 = vector.broadcast %cst_12 : f32 to vector<4x32xf32>
    %17 = vector.extract_strided_slice %5 {offsets = [0, 0], sizes = [4, 128], strides = [1, 1]} : vector<32x128xf32> to vector<4x128xf32>
    %cst_13 = arith.constant dense<0.000000e+00> : vector<4x128xf32>
    %18 = tpu.matmul %15, %6, %cst_13 {dimension_numbers = #tpu.dot_dimension_numbers<[1], [0], [0], [1], [0, 0, 1, 1], [], []>} : vector<4x32xf32>, vector<32x128xf32>, vector<4x128xf32> -> vector<4x128xf32>
    %19 = arith.addf %17, %18 : vector<4x128xf32>
    %20 = arith.negf %19 : vector<4x128xf32>
    %21 = math.exp %20 : vector<4x128xf32>
    %cst_14 = arith.constant 1.000000e+00 : f32
    %22 = vector.broadcast %cst_14 : f32 to vector<4x128xf32>
    %23 = arith.addf %22, %21 : vector<4x128xf32>
    %24 = arith.divf %22, %23 : vector<4x128xf32>
    %cst_15 = arith.constant 2.000000e+00 : f32
    %25 = vector.broadcast %cst_15 : f32 to vector<4x128xf32>
    %26 = arith.mulf %25, %24 : vector<4x128xf32>
    %cst_16 = arith.constant 1.000000e+00 : f32
    %27 = vector.broadcast %cst_16 : f32 to vector<4x128xf32>
    %28 = arith.subf %26, %27 : vector<4x128xf32>
    %29 = arith.select %14, %28, %24 : vector<4x128xi1>, vector<4x128xf32>
    %30 = vector.extract_strided_slice %29 {offsets = [0, 0], sizes = [4, 32], strides = [1, 1]} : vector<4x128xf32> to vector<4x32xf32>
    %31 = vector.extract_strided_slice %29 {offsets = [0, 32], sizes = [4, 32], strides = [1, 1]} : vector<4x128xf32> to vector<4x32xf32>
    %32 = vector.extract_strided_slice %29 {offsets = [0, 64], sizes = [4, 32], strides = [1, 1]} : vector<4x128xf32> to vector<4x32xf32>
    %33 = vector.extract_strided_slice %29 {offsets = [0, 96], sizes = [4, 32], strides = [1, 1]} : vector<4x128xf32> to vector<4x32xf32>
    %34 = arith.mulf %31, %16 : vector<4x32xf32>
    %35 = arith.mulf %30, %32 : vector<4x32xf32>
    %36 = arith.addf %34, %35 : vector<4x32xf32>
    %37 = math.tanh %36 : vector<4x32xf32>
    %38 = arith.mulf %33, %37 : vector<4x32xf32>
    %c0_17 = arith.constant 0 : index
    %c0_18 = arith.constant 0 : index
    %39 = vector.load %arg7[%c0_17, %c0_18] : memref<32x32xf32, #tpu.memory_space<vmem>>, vector<4x32xf32>
    tpu.vector_store %arg7[%c0_17, %c0_18], %38 {strides = array<i32>} : memref<32x32xf32, #tpu.memory_space<vmem>>, vector<4x32xf32>,
    %cst_19 = arith.constant dense<0.000000e+00> : vector<4x8xf32>
    %40 = tpu.matmul %38, %7, %cst_19 {dimension_numbers = #tpu.dot_dimension_numbers<[1], [0], [0], [1], [0, 0, 1, 1], [], []>} : vector<4x32xf32>, vector<32x8xf32>, vector<4x8xf32> -> vector<4x8xf32>
    %41 = vector.broadcast %8 : vector<1x8xf32> to vector<4x8xf32>
    %42 = arith.addf %40, %41 : vector<4x8xf32>
    %c0_20 = arith.constant 0 : index
    %c0_21 = arith.constant 0 : index
    %43 = vector.load %arg6[%c0_20, %c0_21] : memref<32x8xf32, #tpu.memory_space<vmem>>, vector<4x8xf32>
    tpu.vector_store %arg6[%c0_20, %c0_21], %42 {strides = array<i32>} : memref<32x8xf32, #tpu.memory_space<vmem>>, vector<4x8xf32>,
    %44 = vector.extract_strided_slice %5 {offsets = [4, 0], sizes = [4, 128], strides = [1, 1]} : vector<32x128xf32> to vector<4x128xf32>
    %cst_22 = arith.constant dense<0.000000e+00> : vector<4x128xf32>
    %45 = tpu.matmul %38, %6, %cst_22 {dimension_numbers = #tpu.dot_dimension_numbers<[1], [0], [0], [1], [0, 0, 1, 1], [], []>} : vector<4x32xf32>, vector<32x128xf32>, vector<4x128xf32> -> vector<4x128xf32>
    %46 = arith.addf %44, %45 : vector<4x128xf32>
    %47 = arith.negf %46 : vector<4x128xf32>
    %48 = math.exp %47 : vector<4x128xf32>
    %cst_23 = arith.constant 1.000000e+00 : f32
    %49 = vector.broadcast %cst_23 : f32 to vector<4x128xf32>
    %50 = arith.addf %49, %48 : vector<4x128xf32>
    %51 = arith.divf %49, %50 : vector<4x128xf32>
    %cst_24 = arith.constant 2.000000e+00 : f32
    %52 = vector.broadcast %cst_24 : f32 to vector<4x128xf32>
    %53 = arith.mulf %52, %51 : vector<4x128xf32>
    %cst_25 = arith.constant 1.000000e+00 : f32
    %54 = vector.broadcast %cst_25 : f32 to vector<4x128xf32>
    %55 = arith.subf %53, %54 : vector<4x128xf32>
    %56 = arith.select %14, %55, %51 : vector<4x128xi1>, vector<4x128xf32>
    %57 = vector.extract_strided_slice %56 {offsets = [0, 0], sizes = [4, 32], strides = [1, 1]} : vector<4x128xf32> to vector<4x32xf32>
    %58 = vector.extract_strided_slice %56 {offsets = [0, 32], sizes = [4, 32], strides = [1, 1]} : vector<4x128xf32> to vector<4x32xf32>
    %59 = vector.extract_strided_slice %56 {offsets = [0, 64], sizes = [4, 32], strides = [1, 1]} : vector<4x128xf32> to vector<4x32xf32>
    %60 = vector.extract_strided_slice %56 {offsets = [0, 96], sizes = [4, 32], strides = [1, 1]} : vector<4x128xf32> to vector<4x32xf32>
    %61 = arith.mulf %58, %36 : vector<4x32xf32>
    %62 = arith.mulf %57, %59 : vector<4x32xf32>
    %63 = arith.addf %61, %62 : vector<4x32xf32>
    %64 = math.tanh %63 : vector<4x32xf32>
    %65 = arith.mulf %60, %64 : vector<4x32xf32>
    %c4 = arith.constant 4 : index
    %c0_26 = arith.constant 0 : index
    %66 = vector.load %arg7[%c4, %c0_26] : memref<32x32xf32, #tpu.memory_space<vmem>>, vector<4x32xf32>
    tpu.vector_store %arg7[%c4, %c0_26], %65 {strides = array<i32>} : memref<32x32xf32, #tpu.memory_space<vmem>>, vector<4x32xf32>,
    %cst_27 = arith.constant dense<0.000000e+00> : vector<4x8xf32>
    %67 = tpu.matmul %65, %7, %cst_27 {dimension_numbers = #tpu.dot_dimension_numbers<[1], [0], [0], [1], [0, 0, 1, 1], [], []>} : vector<4x32xf32>, vector<32x8xf32>, vector<4x8xf32> -> vector<4x8xf32>
    %68 = vector.broadcast %8 : vector<1x8xf32> to vector<4x8xf32>
    %69 = arith.addf %67, %68 : vector<4x8xf32>
    %c4_28 = arith.constant 4 : index
    %c0_29 = arith.constant 0 : index
    %70 = vector.load %arg6[%c4_28, %c0_29] : memref<32x8xf32, #tpu.memory_space<vmem>>, vector<4x8xf32>
    tpu.vector_store %arg6[%c4_28, %c0_29], %69 {strides = array<i32>} : memref<32x8xf32, #tpu.memory_space<vmem>>, vector<4x8xf32>,
    %71 = vector.extract_strided_slice %5 {offsets = [8, 0], sizes = [4, 128], strides = [1, 1]} : vector<32x128xf32> to vector<4x128xf32>
    %cst_30 = arith.constant dense<0.000000e+00> : vector<4x128xf32>
    %72 = tpu.matmul %65, %6, %cst_30 {dimension_numbers = #tpu.dot_dimension_numbers<[1], [0], [0], [1], [0, 0, 1, 1], [], []>} : vector<4x32xf32>, vector<32x128xf32>, vector<4x128xf32> -> vector<4x128xf32>
    %73 = arith.addf %71, %72 : vector<4x128xf32>
    %74 = arith.negf %73 : vector<4x128xf32>
    %75 = math.exp %74 : vector<4x128xf32>
    %cst_31 = arith.constant 1.000000e+00 : f32
    %76 = vector.broadcast %cst_31 : f32 to vector<4x128xf32>
    %77 = arith.addf %76, %75 : vector<4x128xf32>
    %78 = arith.divf %76, %77 : vector<4x128xf32>
    %cst_32 = arith.constant 2.000000e+00 : f32
    %79 = vector.broadcast %cst_32 : f32 to vector<4x128xf32>
    %80 = arith.mulf %79, %78 : vector<4x128xf32>
    %cst_33 = arith.constant 1.000000e+00 : f32
    %81 = vector.broadcast %cst_33 : f32 to vector<4x128xf32>
    %82 = arith.subf %80, %81 : vector<4x128xf32>
    %83 = arith.select %14, %82, %78 : vector<4x128xi1>, vector<4x128xf32>
    %84 = vector.extract_strided_slice %83 {offsets = [0, 0], sizes = [4, 32], strides = [1, 1]} : vector<4x128xf32> to vector<4x32xf32>
    %85 = vector.extract_strided_slice %83 {offsets = [0, 32], sizes = [4, 32], strides = [1, 1]} : vector<4x128xf32> to vector<4x32xf32>
    %86 = vector.extract_strided_slice %83 {offsets = [0, 64], sizes = [4, 32], strides = [1, 1]} : vector<4x128xf32> to vector<4x32xf32>
    %87 = vector.extract_strided_slice %83 {offsets = [0, 96], sizes = [4, 32], strides = [1, 1]} : vector<4x128xf32> to vector<4x32xf32>
    %88 = arith.mulf %85, %63 : vector<4x32xf32>
    %89 = arith.mulf %84, %86 : vector<4x32xf32>
    %90 = arith.addf %88, %89 : vector<4x32xf32>
    %91 = math.tanh %90 : vector<4x32xf32>
    %92 = arith.mulf %87, %91 : vector<4x32xf32>
    %c8 = arith.constant 8 : index
    %c0_34 = arith.constant 0 : index
    %93 = vector.load %arg7[%c8, %c0_34] : memref<32x32xf32, #tpu.memory_space<vmem>>, vector<4x32xf32>
    tpu.vector_store %arg7[%c8, %c0_34], %92 {strides = array<i32>} : memref<32x32xf32, #tpu.memory_space<vmem>>, vector<4x32xf32>,
    %cst_35 = arith.constant dense<0.000000e+00> : vector<4x8xf32>
    %94 = tpu.matmul %92, %7, %cst_35 {dimension_numbers = #tpu.dot_dimension_numbers<[1], [0], [0], [1], [0, 0, 1, 1], [], []>} : vector<4x32xf32>, vector<32x8xf32>, vector<4x8xf32> -> vector<4x8xf32>
    %95 = vector.broadcast %8 : vector<1x8xf32> to vector<4x8xf32>
    %96 = arith.addf %94, %95 : vector<4x8xf32>
    %c8_36 = arith.constant 8 : index
    %c0_37 = arith.constant 0 : index
    %97 = vector.load %arg6[%c8_36, %c0_37] : memref<32x8xf32, #tpu.memory_space<vmem>>, vector<4x8xf32>
    tpu.vector_store %arg6[%c8_36, %c0_37], %96 {strides = array<i32>} : memref<32x8xf32, #tpu.memory_space<vmem>>, vector<4x8xf32>,
    %98 = vector.extract_strided_slice %5 {offsets = [12, 0], sizes = [4, 128], strides = [1, 1]} : vector<32x128xf32> to vector<4x128xf32>
    %cst_38 = arith.constant dense<0.000000e+00> : vector<4x128xf32>
    %99 = tpu.matmul %92, %6, %cst_38 {dimension_numbers = #tpu.dot_dimension_numbers<[1], [0], [0], [1], [0, 0, 1, 1], [], []>} : vector<4x32xf32>, vector<32x128xf32>, vector<4x128xf32> -> vector<4x128xf32>
    %100 = arith.addf %98, %99 : vector<4x128xf32>
    %101 = arith.negf %100 : vector<4x128xf32>
    %102 = math.exp %101 : vector<4x128xf32>
    %cst_39 = arith.constant 1.000000e+00 : f32
    %103 = vector.broadcast %cst_39 : f32 to vector<4x128xf32>
    %104 = arith.addf %103, %102 : vector<4x128xf32>
    %105 = arith.divf %103, %104 : vector<4x128xf32>
    %cst_40 = arith.constant 2.000000e+00 : f32
    %106 = vector.broadcast %cst_40 : f32 to vector<4x128xf32>
    %107 = arith.mulf %106, %105 : vector<4x128xf32>
    %cst_41 = arith.constant 1.000000e+00 : f32
    %108 = vector.broadcast %cst_41 : f32 to vector<4x128xf32>
    %109 = arith.subf %107, %108 : vector<4x128xf32>
    %110 = arith.select %14, %109, %105 : vector<4x128xi1>, vector<4x128xf32>
    %111 = vector.extract_strided_slice %110 {offsets = [0, 0], sizes = [4, 32], strides = [1, 1]} : vector<4x128xf32> to vector<4x32xf32>
    %112 = vector.extract_strided_slice %110 {offsets = [0, 32], sizes = [4, 32], strides = [1, 1]} : vector<4x128xf32> to vector<4x32xf32>
    %113 = vector.extract_strided_slice %110 {offsets = [0, 64], sizes = [4, 32], strides = [1, 1]} : vector<4x128xf32> to vector<4x32xf32>
    %114 = vector.extract_strided_slice %110 {offsets = [0, 96], sizes = [4, 32], strides = [1, 1]} : vector<4x128xf32> to vector<4x32xf32>
    %115 = arith.mulf %112, %90 : vector<4x32xf32>
    %116 = arith.mulf %111, %113 : vector<4x32xf32>
    %117 = arith.addf %115, %116 : vector<4x32xf32>
    %118 = math.tanh %117 : vector<4x32xf32>
    %119 = arith.mulf %114, %118 : vector<4x32xf32>
    %c12 = arith.constant 12 : index
    %c0_42 = arith.constant 0 : index
    %120 = vector.load %arg7[%c12, %c0_42] : memref<32x32xf32, #tpu.memory_space<vmem>>, vector<4x32xf32>
    tpu.vector_store %arg7[%c12, %c0_42], %119 {strides = array<i32>} : memref<32x32xf32, #tpu.memory_space<vmem>>, vector<4x32xf32>,
    %cst_43 = arith.constant dense<0.000000e+00> : vector<4x8xf32>
    %121 = tpu.matmul %119, %7, %cst_43 {dimension_numbers = #tpu.dot_dimension_numbers<[1], [0], [0], [1], [0, 0, 1, 1], [], []>} : vector<4x32xf32>, vector<32x8xf32>, vector<4x8xf32> -> vector<4x8xf32>
    %122 = vector.broadcast %8 : vector<1x8xf32> to vector<4x8xf32>
    %123 = arith.addf %121, %122 : vector<4x8xf32>
    %c12_44 = arith.constant 12 : index
    %c0_45 = arith.constant 0 : index
    %124 = vector.load %arg6[%c12_44, %c0_45] : memref<32x8xf32, #tpu.memory_space<vmem>>, vector<4x8xf32>
    tpu.vector_store %arg6[%c12_44, %c0_45], %123 {strides = array<i32>} : memref<32x8xf32, #tpu.memory_space<vmem>>, vector<4x8xf32>,
    %125 = vector.extract_strided_slice %5 {offsets = [16, 0], sizes = [4, 128], strides = [1, 1]} : vector<32x128xf32> to vector<4x128xf32>
    %cst_46 = arith.constant dense<0.000000e+00> : vector<4x128xf32>
    %126 = tpu.matmul %119, %6, %cst_46 {dimension_numbers = #tpu.dot_dimension_numbers<[1], [0], [0], [1], [0, 0, 1, 1], [], []>} : vector<4x32xf32>, vector<32x128xf32>, vector<4x128xf32> -> vector<4x128xf32>
    %127 = arith.addf %125, %126 : vector<4x128xf32>
    %128 = arith.negf %127 : vector<4x128xf32>
    %129 = math.exp %128 : vector<4x128xf32>
    %cst_47 = arith.constant 1.000000e+00 : f32
    %130 = vector.broadcast %cst_47 : f32 to vector<4x128xf32>
    %131 = arith.addf %130, %129 : vector<4x128xf32>
    %132 = arith.divf %130, %131 : vector<4x128xf32>
    %cst_48 = arith.constant 2.000000e+00 : f32
    %133 = vector.broadcast %cst_48 : f32 to vector<4x128xf32>
    %134 = arith.mulf %133, %132 : vector<4x128xf32>
    %cst_49 = arith.constant 1.000000e+00 : f32
    %135 = vector.broadcast %cst_49 : f32 to vector<4x128xf32>
    %136 = arith.subf %134, %135 : vector<4x128xf32>
    %137 = arith.select %14, %136, %132 : vector<4x128xi1>, vector<4x128xf32>
    %138 = vector.extract_strided_slice %137 {offsets = [0, 0], sizes = [4, 32], strides = [1, 1]} : vector<4x128xf32> to vector<4x32xf32>
    %139 = vector.extract_strided_slice %137 {offsets = [0, 32], sizes = [4, 32], strides = [1, 1]} : vector<4x128xf32> to vector<4x32xf32>
    %140 = vector.extract_strided_slice %137 {offsets = [0, 64], sizes = [4, 32], strides = [1, 1]} : vector<4x128xf32> to vector<4x32xf32>
    %141 = vector.extract_strided_slice %137 {offsets = [0, 96], sizes = [4, 32], strides = [1, 1]} : vector<4x128xf32> to vector<4x32xf32>
    %142 = arith.mulf %139, %117 : vector<4x32xf32>
    %143 = arith.mulf %138, %140 : vector<4x32xf32>
    %144 = arith.addf %142, %143 : vector<4x32xf32>
    %145 = math.tanh %144 : vector<4x32xf32>
    %146 = arith.mulf %141, %145 : vector<4x32xf32>
    %c16 = arith.constant 16 : index
    %c0_50 = arith.constant 0 : index
    %147 = vector.load %arg7[%c16, %c0_50] : memref<32x32xf32, #tpu.memory_space<vmem>>, vector<4x32xf32>
    tpu.vector_store %arg7[%c16, %c0_50], %146 {strides = array<i32>} : memref<32x32xf32, #tpu.memory_space<vmem>>, vector<4x32xf32>,
    %cst_51 = arith.constant dense<0.000000e+00> : vector<4x8xf32>
    %148 = tpu.matmul %146, %7, %cst_51 {dimension_numbers = #tpu.dot_dimension_numbers<[1], [0], [0], [1], [0, 0, 1, 1], [], []>} : vector<4x32xf32>, vector<32x8xf32>, vector<4x8xf32> -> vector<4x8xf32>
    %149 = vector.broadcast %8 : vector<1x8xf32> to vector<4x8xf32>
    %150 = arith.addf %148, %149 : vector<4x8xf32>
    %c16_52 = arith.constant 16 : index
    %c0_53 = arith.constant 0 : index
    %151 = vector.load %arg6[%c16_52, %c0_53] : memref<32x8xf32, #tpu.memory_space<vmem>>, vector<4x8xf32>
    tpu.vector_store %arg6[%c16_52, %c0_53], %150 {strides = array<i32>} : memref<32x8xf32, #tpu.memory_space<vmem>>, vector<4x8xf32>,
    %152 = vector.extract_strided_slice %5 {offsets = [20, 0], sizes = [4, 128], strides = [1, 1]} : vector<32x128xf32> to vector<4x128xf32>
    %cst_54 = arith.constant dense<0.000000e+00> : vector<4x128xf32>
    %153 = tpu.matmul %146, %6, %cst_54 {dimension_numbers = #tpu.dot_dimension_numbers<[1], [0], [0], [1], [0, 0, 1, 1], [], []>} : vector<4x32xf32>, vector<32x128xf32>, vector<4x128xf32> -> vector<4x128xf32>
    %154 = arith.addf %152, %153 : vector<4x128xf32>
    %155 = arith.negf %154 : vector<4x128xf32>
    %156 = math.exp %155 : vector<4x128xf32>
    %cst_55 = arith.constant 1.000000e+00 : f32
    %157 = vector.broadcast %cst_55 : f32 to vector<4x128xf32>
    %158 = arith.addf %157, %156 : vector<4x128xf32>
    %159 = arith.divf %157, %158 : vector<4x128xf32>
    %cst_56 = arith.constant 2.000000e+00 : f32
    %160 = vector.broadcast %cst_56 : f32 to vector<4x128xf32>
    %161 = arith.mulf %160, %159 : vector<4x128xf32>
    %cst_57 = arith.constant 1.000000e+00 : f32
    %162 = vector.broadcast %cst_57 : f32 to vector<4x128xf32>
    %163 = arith.subf %161, %162 : vector<4x128xf32>
    %164 = arith.select %14, %163, %159 : vector<4x128xi1>, vector<4x128xf32>
    %165 = vector.extract_strided_slice %164 {offsets = [0, 0], sizes = [4, 32], strides = [1, 1]} : vector<4x128xf32> to vector<4x32xf32>
    %166 = vector.extract_strided_slice %164 {offsets = [0, 32], sizes = [4, 32], strides = [1, 1]} : vector<4x128xf32> to vector<4x32xf32>
    %167 = vector.extract_strided_slice %164 {offsets = [0, 64], sizes = [4, 32], strides = [1, 1]} : vector<4x128xf32> to vector<4x32xf32>
    %168 = vector.extract_strided_slice %164 {offsets = [0, 96], sizes = [4, 32], strides = [1, 1]} : vector<4x128xf32> to vector<4x32xf32>
    %169 = arith.mulf %166, %144 : vector<4x32xf32>
    %170 = arith.mulf %165, %167 : vector<4x32xf32>
    %171 = arith.addf %169, %170 : vector<4x32xf32>
    %172 = math.tanh %171 : vector<4x32xf32>
    %173 = arith.mulf %168, %172 : vector<4x32xf32>
    %c20 = arith.constant 20 : index
    %c0_58 = arith.constant 0 : index
    %174 = vector.load %arg7[%c20, %c0_58] : memref<32x32xf32, #tpu.memory_space<vmem>>, vector<4x32xf32>
    tpu.vector_store %arg7[%c20, %c0_58], %173 {strides = array<i32>} : memref<32x32xf32, #tpu.memory_space<vmem>>, vector<4x32xf32>,
    %cst_59 = arith.constant dense<0.000000e+00> : vector<4x8xf32>
    %175 = tpu.matmul %173, %7, %cst_59 {dimension_numbers = #tpu.dot_dimension_numbers<[1], [0], [0], [1], [0, 0, 1, 1], [], []>} : vector<4x32xf32>, vector<32x8xf32>, vector<4x8xf32> -> vector<4x8xf32>
    %176 = vector.broadcast %8 : vector<1x8xf32> to vector<4x8xf32>
    %177 = arith.addf %175, %176 : vector<4x8xf32>
    %c20_60 = arith.constant 20 : index
    %c0_61 = arith.constant 0 : index
    %178 = vector.load %arg6[%c20_60, %c0_61] : memref<32x8xf32, #tpu.memory_space<vmem>>, vector<4x8xf32>
    tpu.vector_store %arg6[%c20_60, %c0_61], %177 {strides = array<i32>} : memref<32x8xf32, #tpu.memory_space<vmem>>, vector<4x8xf32>,
    %179 = vector.extract_strided_slice %5 {offsets = [24, 0], sizes = [4, 128], strides = [1, 1]} : vector<32x128xf32> to vector<4x128xf32>
    %cst_62 = arith.constant dense<0.000000e+00> : vector<4x128xf32>
    %180 = tpu.matmul %173, %6, %cst_62 {dimension_numbers = #tpu.dot_dimension_numbers<[1], [0], [0], [1], [0, 0, 1, 1], [], []>} : vector<4x32xf32>, vector<32x128xf32>, vector<4x128xf32> -> vector<4x128xf32>
    %181 = arith.addf %179, %180 : vector<4x128xf32>
    %182 = arith.negf %181 : vector<4x128xf32>
    %183 = math.exp %182 : vector<4x128xf32>
    %cst_63 = arith.constant 1.000000e+00 : f32
    %184 = vector.broadcast %cst_63 : f32 to vector<4x128xf32>
    %185 = arith.addf %184, %183 : vector<4x128xf32>
    %186 = arith.divf %184, %185 : vector<4x128xf32>
    %cst_64 = arith.constant 2.000000e+00 : f32
    %187 = vector.broadcast %cst_64 : f32 to vector<4x128xf32>
    %188 = arith.mulf %187, %186 : vector<4x128xf32>
    %cst_65 = arith.constant 1.000000e+00 : f32
    %189 = vector.broadcast %cst_65 : f32 to vector<4x128xf32>
    %190 = arith.subf %188, %189 : vector<4x128xf32>
    %191 = arith.select %14, %190, %186 : vector<4x128xi1>, vector<4x128xf32>
    %192 = vector.extract_strided_slice %191 {offsets = [0, 0], sizes = [4, 32], strides = [1, 1]} : vector<4x128xf32> to vector<4x32xf32>
    %193 = vector.extract_strided_slice %191 {offsets = [0, 32], sizes = [4, 32], strides = [1, 1]} : vector<4x128xf32> to vector<4x32xf32>
    %194 = vector.extract_strided_slice %191 {offsets = [0, 64], sizes = [4, 32], strides = [1, 1]} : vector<4x128xf32> to vector<4x32xf32>
    %195 = vector.extract_strided_slice %191 {offsets = [0, 96], sizes = [4, 32], strides = [1, 1]} : vector<4x128xf32> to vector<4x32xf32>
    %196 = arith.mulf %193, %171 : vector<4x32xf32>
    %197 = arith.mulf %192, %194 : vector<4x32xf32>
    %198 = arith.addf %196, %197 : vector<4x32xf32>
    %199 = math.tanh %198 : vector<4x32xf32>
    %200 = arith.mulf %195, %199 : vector<4x32xf32>
    %c24 = arith.constant 24 : index
    %c0_66 = arith.constant 0 : index
    %201 = vector.load %arg7[%c24, %c0_66] : memref<32x32xf32, #tpu.memory_space<vmem>>, vector<4x32xf32>
    tpu.vector_store %arg7[%c24, %c0_66], %200 {strides = array<i32>} : memref<32x32xf32, #tpu.memory_space<vmem>>, vector<4x32xf32>,
    %cst_67 = arith.constant dense<0.000000e+00> : vector<4x8xf32>
    %202 = tpu.matmul %200, %7, %cst_67 {dimension_numbers = #tpu.dot_dimension_numbers<[1], [0], [0], [1], [0, 0, 1, 1], [], []>} : vector<4x32xf32>, vector<32x8xf32>, vector<4x8xf32> -> vector<4x8xf32>
    %203 = vector.broadcast %8 : vector<1x8xf32> to vector<4x8xf32>
    %204 = arith.addf %202, %203 : vector<4x8xf32>
    %c24_68 = arith.constant 24 : index
    %c0_69 = arith.constant 0 : index
    %205 = vector.load %arg6[%c24_68, %c0_69] : memref<32x8xf32, #tpu.memory_space<vmem>>, vector<4x8xf32>
    tpu.vector_store %arg6[%c24_68, %c0_69], %204 {strides = array<i32>} : memref<32x8xf32, #tpu.memory_space<vmem>>, vector<4x8xf32>,
    %206 = vector.extract_strided_slice %5 {offsets = [28, 0], sizes = [4, 128], strides = [1, 1]} : vector<32x128xf32> to vector<4x128xf32>
    %cst_70 = arith.constant dense<0.000000e+00> : vector<4x128xf32>
    %207 = tpu.matmul %200, %6, %cst_70 {dimension_numbers = #tpu.dot_dimension_numbers<[1], [0], [0], [1], [0, 0, 1, 1], [], []>} : vector<4x32xf32>, vector<32x128xf32>, vector<4x128xf32> -> vector<4x128xf32>
    %208 = arith.addf %206, %207 : vector<4x128xf32>
    %209 = arith.negf %208 : vector<4x128xf32>
    %210 = math.exp %209 : vector<4x128xf32>
    %cst_71 = arith.constant 1.000000e+00 : f32
    %211 = vector.broadcast %cst_71 : f32 to vector<4x128xf32>
    %212 = arith.addf %211, %210 : vector<4x128xf32>
    %213 = arith.divf %211, %212 : vector<4x128xf32>
    %cst_72 = arith.constant 2.000000e+00 : f32
    %214 = vector.broadcast %cst_72 : f32 to vector<4x128xf32>
    %215 = arith.mulf %214, %213 : vector<4x128xf32>
    %cst_73 = arith.constant 1.000000e+00 : f32
    %216 = vector.broadcast %cst_73 : f32 to vector<4x128xf32>
    %217 = arith.subf %215, %216 : vector<4x128xf32>
    %218 = arith.select %14, %217, %213 : vector<4x128xi1>, vector<4x128xf32>
    %219 = vector.extract_strided_slice %218 {offsets = [0, 0], sizes = [4, 32], strides = [1, 1]} : vector<4x128xf32> to vector<4x32xf32>
    %220 = vector.extract_strided_slice %218 {offsets = [0, 32], sizes = [4, 32], strides = [1, 1]} : vector<4x128xf32> to vector<4x32xf32>
    %221 = vector.extract_strided_slice %218 {offsets = [0, 64], sizes = [4, 32], strides = [1, 1]} : vector<4x128xf32> to vector<4x32xf32>
    %222 = vector.extract_strided_slice %218 {offsets = [0, 96], sizes = [4, 32], strides = [1, 1]} : vector<4x128xf32> to vector<4x32xf32>
    %223 = arith.mulf %220, %198 : vector<4x32xf32>
    %224 = arith.mulf %219, %221 : vector<4x32xf32>
    %225 = arith.addf %223, %224 : vector<4x32xf32>
    %226 = math.tanh %225 : vector<4x32xf32>
    %227 = arith.mulf %222, %226 : vector<4x32xf32>
    %c28 = arith.constant 28 : index
    %c0_74 = arith.constant 0 : index
    %228 = vector.load %arg7[%c28, %c0_74] : memref<32x32xf32, #tpu.memory_space<vmem>>, vector<4x32xf32>
    tpu.vector_store %arg7[%c28, %c0_74], %227 {strides = array<i32>} : memref<32x32xf32, #tpu.memory_space<vmem>>, vector<4x32xf32>,
    %cst_75 = arith.constant dense<0.000000e+00> : vector<4x8xf32>
    %229 = tpu.matmul %227, %7, %cst_75 {dimension_numbers = #tpu.dot_dimension_numbers<[1], [0], [0], [1], [0, 0, 1, 1], [], []>} : vector<4x32xf32>, vector<32x8xf32>, vector<4x8xf32> -> vector<4x8xf32>
    %230 = vector.broadcast %8 : vector<1x8xf32> to vector<4x8xf32>
    %231 = arith.addf %229, %230 : vector<4x8xf32>
    %c28_76 = arith.constant 28 : index
    %c0_77 = arith.constant 0 : index
    %232 = vector.load %arg6[%c28_76, %c0_77] : memref<32x8xf32, #tpu.memory_space<vmem>>, vector<4x8xf32>
    tpu.vector_store %arg6[%c28_76, %c0_77], %231 {strides = array<i32>} : memref<32x8xf32, #tpu.memory_space<vmem>>, vector<4x8xf32>,
    return
  }
}

</mosaic_0001>

<bundles_post_ra>
// kernel: tpu_custom_call.1
= control target key start
LH: loop header
LB: loop body
LE: loop exit
PB: predicated region body
PF: predicated region fallthrough
CT: control target
= control target key end

     0   :  { %v2015_v3 = vmov 0.0   ;;  %vm39_vm0 = vcmask 130048   ;;  %s2446_s0 = inlined_call_operand.vmem [shape: f32[32,16], index: 0, kind: input, shape index: {}]   ;;  %s2447_s1 = inlined_call_operand.vmem [shape: f32[16,128], index: 1, kind: input, shape index: {}]   ;;  %s2448_s2 = inlined_call_operand.vmem [shape: f32[32,128], index: 2, kind: input, shape index: {}]   ;;  %s2449_s3 = inlined_call_operand.vmem [shape: f32[1,128], index: 3, kind: input, shape index: {}]   ;;  %s2450_s4 = inlined_call_operand.vmem [shape: f32[32,8], index: 4, kind: input, shape index: {}]   ;;  %s2451_s5 = inlined_call_operand.vmem [shape: f32[1,8], index: 5, kind: input, shape index: {}]   ;;  %s2452_s6 = inlined_call_operand.vmem [shape: f32[32,8], index: 6, kind: output, shape index: {0}]   ;;  %s2453_s7 = inlined_call_operand.hbm [shape: f32[32,32], index: 7, kind: output, shape index: {1}]  }
   0x1   :  { %v31_v0 = vld [vmem:[%s2447_s1 + $0x8] sm:$0xff]  ;;  %v2068_v1 = vld [vmem:[%s2448_s2 + $0x18] sm:$0xff]  ;;  %v30_v2 = vld [vmem:[%s2447_s1] sm:$0xff]  ;;  %1762 = vmatprep.subr.mxu1 %v2015_v3 }
   0x2   :  { %1752 = vmatprep.subr.mxu0 %v31_v0  ;;  %v26_v4 = vld [vmem:[%s2446_s0] sm:$0xff]  ;;  %1763 = vmatpush3.msra.mxu1 %v2068_v1  ;;  %v2081_v5 = vld [vmem:[%s2448_s2 + $0x10] sm:$0xff]  ;;  %v27_v6 = vld [vmem:[%s2446_s0 + $0x8] sm:$0xff] }
   0x3   :  { %1753 = vmatpush3.msra.mxu0 %v31_v0 }
   0x4   :  { %13 = vsyncpa [#allocation3], 0  ;;  %1754 = vmatprep.subr.mxu0 %v30_v2  ;;  %1764 = vmatprep.subr.mxu1 %v2015_v3  ;;  %v2091_v7 = vld [vmem:[%s2448_s2 + $0x8] sm:$0xff]  ;;  %v2099_v8 = vld [vmem:[%s2448_s2] sm:$0xff]  ;;  %vm2016_vm1 = vmmov 0   ;;  %v146_v19 = vlaneseq  ;;  %s2018_s17 = smov 32  }
   0x5   :  { %1755 = vmatpush3.msra.mxu0 %v30_v2  ;;  %1756 = vmatprep.mubr.msk.f32.mxu0 %vm39_vm0, %v26_v4  ;;  %v2124_v10 = vld [vmem:[%s2449_s3] ss:$0 sm:$0xff]  ;;  %s2017_s3 = smov 64   ;;  %v2144_v31 = vld [vmem:[%s2450_s4 + $0x18] sm:$0xff]  ;;  %v28_v32 = vld [vmem:[%s2446_s0 + $0x10] sm:$0xff]  ;;  %vm256_vm5 = vcmask 257024  }
   0x6   :  { %1765 = vmatpush3.msra.mxu1 %v2081_v5  ;;  %1757 = vmatmul.mubr.msk.f32.vlgmr.msra.gmra.mxu0 %vm39_vm0, %v27_v6  ;;  %v147_v20 = vand.u32 127, %v146_v19  ;;  %v2152_v33 = vld [vmem:[%s2450_s4 + $0x10] sm:$0xff]  ;;  %v29_v34 = vld [vmem:[%s2446_s0 + $0x18] sm:$0xff]  ;;  %v2164_v35 = vld [vmem:[%s2450_s4 + $0x8] sm:$0xff]  ;;  %vm151_vm6 = vcmask 261120   ;;  %vm336_vm7 = vcmask 60416  }
   0x7   :  { %1766 = vmatprep.subr.mxu1 %v2015_v3  ;;  %1770 = vmatprep.mubr.msk.f32.mxu1 %vm2016_vm1, %v2015_v3  ;;  %v2173_v36 = vld [vmem:[%s2450_s4] sm:$0xff]  ;;  %vm445_vm8 = vcmask 261124  }
   0x8   :  { %1767 = vmatpush3.msra.mxu1 %v2091_v7  ;;  %1773 = vmatprep.subr.mxu0 %v2015_v3  ;;  %vm148_vm2 = vcmp.ge.s32.totalorder %v147_v20, 64  ;;  %vm149_vm3 = vcmp.lt.s32.totalorder %v147_v20, 96  ;;  %v2211_v43 = vld [vmem:[%s2451_s5] ss:$0 sm:$0xff] }
   0x9   :  { %1768 = vmatprep.subr.mxu1 %v2015_v3  ;;  %vm2130_vm4 = vmand %vm148_vm2, %vm149_vm3  ;;  %1774 = vmatpush3.msra.mxu0 %v2144_v31 }
   0xa   :  { %1769 = vmatpush3.msra.mxu1 %v2099_v8  ;;  %1759 = vmatprep.mubr.msk.f32.mxu0 %vm39_vm0, %v28_v32 }
   0xb   :  { %1771 = vmatmul.mubr.f32.vlgmr.msra.gmra.mxu1 %v2015_v3  ;;  %1784 = vmatprep.subr.mxu1 %v2015_v3 }
   0xc   :  { %1785 = vmatpush3.msra.mxu1 %v2068_v1  ;;  %1792 = vmatprep.mubr.msk.f32.mxu1 %vm2016_vm1, %v2015_v3 }
   0xd   :  { %1786 = vmatprep.subr.mxu1 %v2015_v3  ;;  %1775 = vmatprep.subr.mxu0 %v2015_v3 }
   0xe   :  { %1787 = vmatpush3.msra.mxu1 %v2081_v5  ;;  %1760 = vmatmul.mubr.msk.f32.gmra.mxu0 %vm39_vm0, %v29_v34 }
   0xf   :  { %1788 = vmatprep.subr.mxu1 %v2015_v3  ;;  %1776 = vmatpush3.msra.mxu0 %v2152_v33 }
  0x10   :  { %1789 = vmatpush3.msra.mxu1 %v2091_v7  ;;  %1781 = vmatprep.mubr.msk.f32.mxu0 %vm2016_vm1, %v2015_v3 }
  0x11   :  { %1790 = vmatprep.subr.mxu1 %v2015_v3  ;;  %1777 = vmatprep.subr.mxu0 %v2015_v3 }
  0x12   :  { %1791 = vmatpush3.msra.mxu1 %v2099_v8  ;;  %1778 = vmatpush3.msra.mxu0 %v2164_v35 }
  0x13   :  { %1806 = vmatprep.subr.mxu1 %v2015_v3  ;;  %1779 = vmatprep.subr.mxu0 %v2015_v3 }
  0x14   :  { %1780 = vmatpush3.msra.mxu0 %v2173_v36 }
  0x15   :  { %1795 = vmatprep.subr.mxu0 %v2015_v3 }
  0xc6   :  { %v2119_v9 = vpop.f32.mrf.mxu0 }
  0xc8   :  { %v118_v11 = vpop.f32.mrf.mxu0 }
  0xc9   :  { %v2127_v12 = vadd.f32 %v2124_v10, %v118_v11 }
  0xcb   :  { %v221_v13 = vpop.f32.mrf.mxu1 }
  0xcc   :  { %v225_v14 = vadd.f32 %v221_v13, %v2127_v12 }
  0xcd   :  { %v1772_v15 = vpop.f32.mrf.mxu1 }
  0xce   :  { %v1634_v16 = vmul.f32 -1.442695, %v225_v14  ;;  %v2204_v41 = vpop.f32.mrf.mxu0 }
  0xd0   :  { %1945 = vpow2.f32 %v1634_v16  ;;  %v2206_v42 = vpop.f32.mrf.mxu0 }
  0xdd   :  { %v1946_v17 = vpop.eup %1945 }
  0xde   :  { %v229_v18 = vadd.f32 1.0, %v1946_v17 }
  0xe0   :  { %1947 = vrcp.f32 %v229_v18 }
  0xed   :  { %v1948_v21 = vpop.eup %1947 }
  0xee   :  { %v232_v22 = vmul.f32 2.0, %v1948_v21 }
  0xf0   :  { %v1635_v24 = vadd.f32 -1.0, %v232_v22 }
  0xf2   :  { %v234_v25 = vsel %vm2130_vm4, %v1635_v24, %v1948_v21 }
  0xf3   :  { %237 = vrot.lane.b32.xlu0 %v234_v25, %s2017_s3  ;;  %v235_v28 = vmul.f32 0.0, %v234_v25 }
 0x165   :  { %v238_v26 = vpop.permute.xlu0 %237 }
 0x166   :  { %v240_v27 = vmul.f32 %v238_v26, %v234_v25 }
 0x168   :  { %242 = vrot.lane.b32.xlu0 %v240_v27, %s2018_s17 }
 0x1da   :  { %v243_v29 = vpop.permute.xlu0 %242 }
 0x1db   :  { %v2138_v30 = vadd.f32 %v243_v29, %v235_v28 }
 0x1dd   :  { %1949 = vtanh.f32 %v2138_v30  ;;  %v422_v60 = vrot.slane %v2138_v30, 4 }
 0x1ea   :  { %v1950_v37 = vpop.eup %1949 }
 0x1eb   :  { %248 = vrot.lane.b32.xlu1 %v1950_v37, %s2017_s3 }
 0x25d   :  { %v249_v38 = vpop.permute.xlu1 %248 }
 0x25e   :  { %v251_v39 = vmul.f32 %v249_v38, %v234_v25 }
 0x260   :  { %253 = vrot.lane.b32.xlu1 %v251_v39, %s2018_s17 }
 0x2d2   :  { %v254_v40 = vpop.permute.xlu1 %253 }
 0x2d3   :  { %257 = vst.msk [vmem:[#allocation2] sm:$0xf] %vm256_vm5, %v254_v40  ;;  %1782 = vmatmul.mubr.msk.f32.vlgmr.msra.gmra.mxu0 %vm151_vm6, %v254_v40  ;;  %1793 = vmatmul.mubr.msk.f32.vlgmr.msra.gmra.mxu1 %vm151_vm6, %v254_v40 }
 0x2d4   :  { %1796 = vmatpush3.msra.mxu0 %v2144_v31  ;;  %1807 = vmatpush3.msra.mxu1 %v2068_v1 }
 0x2d5   :  { %1797 = vmatprep.subr.mxu0 %v2015_v3  ;;  %1808 = vmatprep.subr.mxu1 %v2015_v3 }
 0x2d6   :  { %1798 = vmatpush3.msra.mxu0 %v2152_v33  ;;  %1809 = vmatpush3.msra.mxu1 %v2081_v5 }
 0x2d7   :  { %1799 = vmatprep.subr.mxu0 %v2015_v3  ;;  %1810 = vmatprep.subr.mxu1 %v2015_v3 }
 0x2d8   :  { %1800 = vmatpush3.msra.mxu0 %v2164_v35  ;;  %1811 = vmatpush3.msra.mxu1 %v2091_v7 }
 0x2d9   :  { %1801 = vmatprep.subr.mxu0 %v2015_v3  ;;  %1812 = vmatprep.subr.mxu1 %v2015_v3 }
 0x2da   :  { %1813 = vmatpush3.msra.mxu1 %v2099_v8  ;;  %1814 = vmatprep.mubr.msk.f32.mxu1 %vm2016_vm1, %v2015_v3 }
 0x2db   :  { %1802 = vmatpush3.msra.mxu0 %v2173_v36  ;;  %1803 = vmatprep.mubr.msk.f32.mxu0 %vm2016_vm1, %v2015_v3 }
 0x2dc   :  { %1817 = vmatprep.subr.mxu0 %v2015_v3  ;;  %1828 = vmatprep.subr.mxu1 %v2015_v3 }
 0x393   :  { %v332_v44 = vpop.f32.mrf.mxu0  ;;  %v404_v45 = vpop.f32.mrf.mxu1 }
 0x394   :  { %v333_v46 = vadd.f32 %v2211_v43, %v332_v44  ;;  %v409_v47 = vrot.slane %v404_v45, 4 }
 0x395   :  { %v1783_v48 = vpop.f32.mrf.mxu0  ;;  %v1794_v49 = vpop.f32.mrf.mxu1 }
 0x396   :  { %337 = vst.msk [vmem:[%s2452_s6] sm:$0xf] %vm336_vm7, %v333_v46  ;;  %v411_v50 = vadd.f32 %v409_v47, %v2127_v12  ;;  %v124_v12 = vadd.f32 %v2119_v9, %v2124_v10 }
 0x398   :  { %v1639_v51 = vmul.f32 -1.442695, %v411_v50 }
 0x39a   :  { %1951 = vpow2.f32 %v1639_v51 }
 0x3a7   :  { %v1952_v52 = vpop.eup %1951 }
 0x3a8   :  { %v415_v53 = vadd.f32 1.0, %v1952_v52 }
 0x3aa   :  { %1953 = vrcp.f32 %v415_v53 }
 0x3b7   :  { %v1954_v54 = vpop.eup %1953 }
 0x3b8   :  { %v418_v55 = vmul.f32 2.0, %v1954_v54 }
 0x3ba   :  { %v1640_v56 = vadd.f32 -1.0, %v418_v55 }
 0x3bc   :  { %v420_v57 = vsel %vm2130_vm4, %v1640_v56, %v1954_v54 }
 0x3bd   :  { %426 = vrot.lane.b32.xlu0 %v420_v57, %s2017_s3  ;;  %v424_v61 = vmul.f32 %v422_v60, %v420_v57 }
 0x42f   :  { %v427_v58 = vpop.permute.xlu0 %426 }
 0x430   :  { %v429_v59 = vmul.f32 %v427_v58, %v420_v57 }
 0x432   :  { %431 = vrot.lane.b32.xlu1 %v429_v59, %s2018_s17 }
 0x4a4   :  { %v432_v62 = vpop.permute.xlu1 %431 }
 0x4a5   :  { %v434_v63 = vadd.f32 %v432_v62, %v424_v61 }
 0x4a7   :  { %1955 = vtanh.f32 %v434_v63  ;;  %v604_v28 = vrot.slane %v434_v63, 4 }
 0x4b4   :  { %v1956_v0 = vpop.eup %1955 }
 0x4b5   :  { %437 = vrot.lane.b32.xlu0 %v1956_v0, %s2017_s3 }
 0x527   :  { %v438_v2 = vpop.permute.xlu0 %437 }
 0x528   :  { %v2225_v4 = vmul.f32 %v438_v2, %v420_v57 }
 0x52a   :  { %v447_v6 = vrot.slane %v2225_v4, 4 }
 0x52c   :  { %448 = vrot.lane.b32.xlu1 %v447_v6, %s2018_s17 }
 0x59e   :  { %v449_v11 = vpop.permute.xlu1 %448 }
 0x59f   :  { %1804 = vmatmul.mubr.msk.f32.vlgmr.msra.gmra.mxu0 %vm151_vm6, %v449_v11  ;;  %1815 = vmatmul.mubr.msk.f32.vlgmr.msra.gmra.mxu1 %vm151_vm6, %v449_v11 }
 0x5a0   :  { %1818 = vmatpush3.msra.mxu0 %v2144_v31  ;;  %1829 = vmatpush3.msra.mxu1 %v2068_v1 }
 0x5a1   :  { %1819 = vmatprep.subr.mxu0 %v2015_v3  ;;  %1830 = vmatprep.subr.mxu1 %v2015_v3 }
 0x5a2   :  { %1820 = vmatpush3.msra.mxu0 %v2152_v33  ;;  %1831 = vmatpush3.msra.mxu1 %v2081_v5 }
 0x5a3   :  { %1821 = vmatprep.subr.mxu0 %v2015_v3  ;;  %1832 = vmatprep.subr.mxu1 %v2015_v3 }
 0x5a4   :  { %1822 = vmatpush3.msra.mxu0 %v2164_v35  ;;  %1833 = vmatpush3.msra.mxu1 %v2091_v7 }
 0x5a5   :  { %1823 = vmatprep.subr.mxu0 %v2015_v3  ;;  %1834 = vmatprep.subr.mxu1 %v2015_v3 }
 0x5a6   :  { %1835 = vmatpush3.msra.mxu1 %v2099_v8  ;;  %1836 = vmatprep.mubr.msk.f32.mxu1 %vm2016_vm1, %v2015_v3 }
 0x5a7   :  { %1824 = vmatpush3.msra.mxu0 %v2173_v36  ;;  %1825 = vmatprep.mubr.msk.f32.mxu0 %vm2016_vm1, %v2015_v3 }
 0x5a8   :  { %1839 = vmatprep.subr.mxu0 %v2015_v3  ;;  %1850 = vmatprep.subr.mxu1 %v2015_v3 }
 0x65f   :  { %v518_v13 = vpop.f32.mrf.mxu0  ;;  %v589_v14 = vpop.f32.mrf.mxu1 }
 0x660   :  { %v519_v15 = vadd.f32 %v2211_v43, %v518_v13  ;;  %v593_v16 = vadd.f32 %v589_v14, %v124_v12 }
 0x661   :  { %v1805_v17 = vpop.f32.mrf.mxu0  ;;  %v1816_v18 = vpop.f32.mrf.mxu1 }
 0x662   :  { %522 = vst.msk [vmem:[%s2452_s6 + $0x4] sm:$0xf] %vm336_vm7, %v519_v15  ;;  %v1643_v19 = vmul.f32 -1.442695, %v593_v16 }
 0x664   :  { %1957 = vpow2.f32 %v1643_v19 }
 0x671   :  { %v1958_v20 = vpop.eup %1957 }
 0x672   :  { %v597_v21 = vadd.f32 1.0, %v1958_v20 }
 0x674   :  { %1959 = vrcp.f32 %v597_v21 }
 0x681   :  { %v1960_v22 = vpop.eup %1959 }
 0x682   :  { %v600_v24 = vmul.f32 2.0, %v1960_v22 }
 0x684   :  { %v1644_v9 = vadd.f32 -1.0, %v600_v24 }
 0x686   :  { %v602_v25 = vsel %vm2130_vm4, %v1644_v9, %v1960_v22 }
 0x687   :  { %608 = vrot.lane.b32.xlu0 %v602_v25, %s2017_s3  ;;  %v606_v29 = vmul.f32 %v604_v28, %v602_v25 }
 0x6f9   :  { %v609_v26 = vpop.permute.xlu0 %608 }
 0x6fa   :  { %v611_v27 = vmul.f32 %v609_v26, %v602_v25 }
 0x6fc   :  { %613 = vrot.lane.b32.xlu1 %v611_v27, %s2018_s17 }
 0x76e   :  { %v614_v30 = vpop.permute.xlu1 %613 }
 0x76f   :  { %v616_v32 = vadd.f32 %v614_v30, %v606_v29 }
 0x771   :  { %1961 = vtanh.f32 %v616_v32  ;;  %v785_v59 = vrot.slane %v616_v32, 4 }
 0x77e   :  { %v1962_v34 = vpop.eup %1961 }
 0x77f   :  { %619 = vrot.lane.b32.xlu0 %v1962_v34, %s2017_s3 }
 0x7f1   :  { %v620_v37 = vpop.permute.xlu0 %619 }
 0x7f2   :  { %v622_v38 = vmul.f32 %v620_v37, %v602_v25 }
 0x7f4   :  { %624 = vrot.lane.b32.xlu1 %v622_v38, %s2018_s17 }
 0x866   :  { %v625_v39 = vpop.permute.xlu1 %624 }
 0x867   :  { %627 = vst.msk [vmem:[#allocation2 + $0x8] sm:$0xf] %vm256_vm5, %v625_v39  ;;  %1826 = vmatmul.mubr.msk.f32.vlgmr.msra.gmra.mxu0 %vm151_vm6, %v625_v39  ;;  %1837 = vmatmul.mubr.msk.f32.vlgmr.msra.gmra.mxu1 %vm151_vm6, %v625_v39 }
 0x868   :  { %1840 = vmatpush3.msra.mxu0 %v2144_v31  ;;  %1851 = vmatpush3.msra.mxu1 %v2068_v1 }
 0x869   :  { %1841 = vmatprep.subr.mxu0 %v2015_v3  ;;  %1852 = vmatprep.subr.mxu1 %v2015_v3 }
 0x86a   :  { %1842 = vmatpush3.msra.mxu0 %v2152_v33  ;;  %1853 = vmatpush3.msra.mxu1 %v2081_v5 }
 0x86b   :  { %1843 = vmatprep.subr.mxu0 %v2015_v3  ;;  %1854 = vmatprep.subr.mxu1 %v2015_v3 }
 0x86c   :  { %1844 = vmatpush3.msra.mxu0 %v2164_v35  ;;  %1855 = vmatpush3.msra.mxu1 %v2091_v7 }
 0x86d   :  { %1845 = vmatprep.subr.mxu0 %v2015_v3  ;;  %1856 = vmatprep.subr.mxu1 %v2015_v3 }
 0x86e   :  { %1857 = vmatpush3.msra.mxu1 %v2099_v8  ;;  %1858 = vmatprep.mubr.msk.f32.mxu1 %vm2016_vm1, %v2015_v3 }
 0x86f   :  { %1846 = vmatpush3.msra.mxu0 %v2173_v36  ;;  %1847 = vmatprep.mubr.msk.f32.mxu0 %vm2016_vm1, %v2015_v3 }
 0x870   :  { %1861 = vmatprep.subr.mxu0 %v2015_v3  ;;  %1872 = vmatprep.subr.mxu1 %v2015_v3 }
 0x927   :  { %v696_v40 = vpop.f32.mrf.mxu0  ;;  %v767_v44 = vpop.f32.mrf.mxu1 }
 0x928   :  { %v697_v45 = vadd.f32 %v2211_v43, %v696_v40  ;;  %v772_v46 = vrot.slane %v767_v44, 4 }
 0x929   :  { %v1827_v47 = vpop.f32.mrf.mxu0  ;;  %v1838_v48 = vpop.f32.mrf.mxu1 }
 0x92a   :  { %700 = vst.msk [vmem:[%s2452_s6 + $0x8] sm:$0xf] %vm336_vm7, %v697_v45  ;;  %v774_v49 = vadd.f32 %v772_v46, %v124_v12  ;;  %v129_v12 = vadd.f32 %v2124_v10, %v2206_v42 }
 0x92c   :  { %v1647_v50 = vmul.f32 -1.442695, %v774_v49 }
 0x92e   :  { %1963 = vpow2.f32 %v1647_v50 }
 0x93b   :  { %v1964_v51 = vpop.eup %1963 }
 0x93c   :  { %v778_v52 = vadd.f32 1.0, %v1964_v51 }
 0x93e   :  { %1965 = vrcp.f32 %v778_v52 }
 0x94b   :  { %v1966_v53 = vpop.eup %1965 }
 0x94c   :  { %v781_v54 = vmul.f32 2.0, %v1966_v53 }
 0x94e   :  { %v1648_v55 = vadd.f32 -1.0, %v781_v54 }
 0x950   :  { %v783_v56 = vsel %vm2130_vm4, %v1648_v55, %v1966_v53 }
 0x951   :  { %789 = vrot.lane.b32.xlu0 %v783_v56, %s2017_s3  ;;  %v787_v60 = vmul.f32 %v785_v59, %v783_v56 }
 0x9c3   :  { %v790_v57 = vpop.permute.xlu0 %789 }
 0x9c4   :  { %v792_v58 = vmul.f32 %v790_v57, %v783_v56 }
 0x9c6   :  { %794 = vrot.lane.b32.xlu1 %v792_v58, %s2018_s17 }
 0xa38   :  { %v795_v61 = vpop.permute.xlu1 %794 }
 0xa39   :  { %v797_v62 = vadd.f32 %v795_v61, %v787_v60 }
 0xa3b   :  { %1967 = vtanh.f32 %v797_v62  ;;  %v966_v27 = vrot.slane %v797_v62, 4 }
 0xa48   :  { %v1968_v63 = vpop.eup %1967 }
 0xa49   :  { %800 = vrot.lane.b32.xlu0 %v1968_v63, %s2017_s3 }
 0xabb   :  { %v801_v0 = vpop.permute.xlu0 %800 }
 0xabc   :  { %v2297_v2 = vmul.f32 %v801_v0, %v783_v56 }
 0xabe   :  { %v809_v6 = vrot.slane %v2297_v2, 4 }
 0xac0   :  { %810 = vrot.lane.b32.xlu1 %v809_v6, %s2018_s17 }
 0xb32   :  { %v811_v11 = vpop.permute.xlu1 %810 }
 0xb33   :  { %1848 = vmatmul.mubr.msk.f32.vlgmr.msra.gmra.mxu0 %vm151_vm6, %v811_v11  ;;  %1859 = vmatmul.mubr.msk.f32.vlgmr.msra.gmra.mxu1 %vm151_vm6, %v811_v11 }
 0xb34   :  { %1862 = vmatpush3.msra.mxu0 %v2144_v31  ;;  %1873 = vmatpush3.msra.mxu1 %v2068_v1 }
 0xb35   :  { %1863 = vmatprep.subr.mxu0 %v2015_v3  ;;  %1874 = vmatprep.subr.mxu1 %v2015_v3 }
 0xb36   :  { %1864 = vmatpush3.msra.mxu0 %v2152_v33  ;;  %1875 = vmatpush3.msra.mxu1 %v2081_v5 }
 0xb37   :  { %1865 = vmatprep.subr.mxu0 %v2015_v3  ;;  %1876 = vmatprep.subr.mxu1 %v2015_v3 }
 0xb38   :  { %1866 = vmatpush3.msra.mxu0 %v2164_v35  ;;  %1877 = vmatpush3.msra.mxu1 %v2091_v7 }
 0xb39   :  { %1867 = vmatprep.subr.mxu0 %v2015_v3  ;;  %1878 = vmatprep.subr.mxu1 %v2015_v3 }
 0xb3a   :  { %1879 = vmatpush3.msra.mxu1 %v2099_v8  ;;  %1880 = vmatprep.mubr.msk.f32.mxu1 %vm2016_vm1, %v2015_v3 }
 0xb3b   :  { %1868 = vmatpush3.msra.mxu0 %v2173_v36  ;;  %1869 = vmatprep.mubr.msk.f32.mxu0 %vm2016_vm1, %v2015_v3 }
 0xb3c   :  { %1883 = vmatprep.subr.mxu0 %v2015_v3  ;;  %1894 = vmatprep.subr.mxu1 %v2015_v3 }
 0xbf3   :  { %v880_v13 = vpop.f32.mrf.mxu0  ;;  %v951_v14 = vpop.f32.mrf.mxu1 }
 0xbf4   :  { %v881_v15 = vadd.f32 %v2211_v43, %v880_v13  ;;  %v955_v16 = vadd.f32 %v951_v14, %v129_v12 }
 0xbf5   :  { %v1849_v17 = vpop.f32.mrf.mxu0  ;;  %v1860_v18 = vpop.f32.mrf.mxu1 }
 0xbf6   :  { %884 = vst.msk [vmem:[%s2452_s6 + $0xc] sm:$0xf] %vm336_vm7, %v881_v15  ;;  %v1651_v19 = vmul.f32 -1.442695, %v955_v16 }
 0xbf8   :  { %1969 = vpow2.f32 %v1651_v19 }
 0xc05   :  { %v1970_v20 = vpop.eup %1969 }
 0xc06   :  { %v959_v21 = vadd.f32 1.0, %v1970_v20 }
 0xc08   :  { %1971 = vrcp.f32 %v959_v21 }
 0xc15   :  { %v1972_v22 = vpop.eup %1971 }
 0xc16   :  { %v962_v24 = vmul.f32 2.0, %v1972_v22 }
 0xc18   :  { %v1652_v42 = vadd.f32 -1.0, %v962_v24 }
 0xc1a   :  { %v964_v9 = vsel %vm2130_vm4, %v1652_v42, %v1972_v22 }
 0xc1b   :  { %970 = vrot.lane.b32.xlu0 %v964_v9, %s2017_s3  ;;  %v968_v28 = vmul.f32 %v966_v27, %v964_v9 }
 0xc8d   :  { %v971_v25 = vpop.permute.xlu0 %970 }
 0xc8e   :  { %v973_v26 = vmul.f32 %v971_v25, %v964_v9 }
 0xc90   :  { %975 = vrot.lane.b32.xlu1 %v973_v26, %s2018_s17 }
 0xd02   :  { %v976_v29 = vpop.permute.xlu1 %975 }
 0xd03   :  { %v978_v30 = vadd.f32 %v976_v29, %v968_v28 }
 0xd05   :  { %1973 = vtanh.f32 %v978_v30  ;;  %v1147_v58 = vrot.slane %v978_v30, 4 }
 0xd12   :  { %v1974_v32 = vpop.eup %1973 }
 0xd13   :  { %981 = vrot.lane.b32.xlu0 %v1974_v32, %s2017_s3 }
 0xd85   :  { %v982_v34 = vpop.permute.xlu0 %981 }
 0xd86   :  { %v984_v37 = vmul.f32 %v982_v34, %v964_v9 }
 0xd88   :  { %986 = vrot.lane.b32.xlu1 %v984_v37, %s2018_s17 }
 0xdfa   :  { %v987_v38 = vpop.permute.xlu1 %986 }
 0xdfb   :  { %989 = vst.msk [vmem:[#allocation2 + $0x10] sm:$0xf] %vm256_vm5, %v987_v38  ;;  %1870 = vmatmul.mubr.msk.f32.vlgmr.msra.gmra.mxu0 %vm151_vm6, %v987_v38  ;;  %1881 = vmatmul.mubr.msk.f32.vlgmr.msra.gmra.mxu1 %vm151_vm6, %v987_v38 }
 0xdfc   :  { %1884 = vmatpush3.msra.mxu0 %v2144_v31  ;;  %1895 = vmatpush3.msra.mxu1 %v2068_v1 }
 0xdfd   :  { %1885 = vmatprep.subr.mxu0 %v2015_v3  ;;  %1896 = vmatprep.subr.mxu1 %v2015_v3 }
 0xdfe   :  { %1886 = vmatpush3.msra.mxu0 %v2152_v33  ;;  %1897 = vmatpush3.msra.mxu1 %v2081_v5 }
 0xdff   :  { %1887 = vmatprep.subr.mxu0 %v2015_v3  ;;  %1898 = vmatprep.subr.mxu1 %v2015_v3 }
 0xe00   :  { %1888 = vmatpush3.msra.mxu0 %v2164_v35  ;;  %1899 = vmatpush3.msra.mxu1 %v2091_v7 }
 0xe01   :  { %1889 = vmatprep.subr.mxu0 %v2015_v3  ;;  %1900 = vmatprep.subr.mxu1 %v2015_v3 }
 0xe02   :  { %1901 = vmatpush3.msra.mxu1 %v2099_v8  ;;  %1902 = vmatprep.mubr.msk.f32.mxu1 %vm2016_vm1, %v2015_v3 }
 0xe03   :  { %1890 = vmatpush3.msra.mxu0 %v2173_v36  ;;  %1891 = vmatprep.mubr.msk.f32.mxu0 %vm2016_vm1, %v2015_v3 }
 0xe04   :  { %1905 = vmatprep.subr.mxu0 %v2015_v3  ;;  %1916 = vmatprep.subr.mxu1 %v2015_v3 }
 0xebb   :  { %v1058_v39 = vpop.f32.mrf.mxu0  ;;  %v1129_v40 = vpop.f32.mrf.mxu1 }
 0xebc   :  { %v1059_v44 = vadd.f32 %v2211_v43, %v1058_v39  ;;  %v1134_v45 = vrot.slane %v1129_v40, 4 }
 0xebd   :  { %v1871_v46 = vpop.f32.mrf.mxu0  ;;  %v1882_v47 = vpop.f32.mrf.mxu1 }
 0xebe   :  { %1062 = vst.msk [vmem:[%s2452_s6 + $0x10] sm:$0xf] %vm336_vm7, %v1059_v44  ;;  %v1136_v48 = vadd.f32 %v1134_v45, %v129_v12 }
 0xec0   :  { %v1655_v49 = vmul.f32 -1.442695, %v1136_v48 }
 0xec2   :  { %1975 = vpow2.f32 %v1655_v49 }
 0xecf   :  { %v1976_v50 = vpop.eup %1975 }
 0xed0   :  { %v1140_v51 = vadd.f32 1.0, %v1976_v50 }
 0xed2   :  { %1977 = vrcp.f32 %v1140_v51 }
 0xedf   :  { %v1978_v52 = vpop.eup %1977 }
 0xee0   :  { %v1143_v53 = vmul.f32 2.0, %v1978_v52 }
 0xee2   :  { %v1656_v54 = vadd.f32 -1.0, %v1143_v53 }
 0xee4   :  { %v1145_v55 = vsel %vm2130_vm4, %v1656_v54, %v1978_v52 }
 0xee5   :  { %1151 = vrot.lane.b32.xlu0 %v1145_v55, %s2017_s3  ;;  %v1149_v59 = vmul.f32 %v1147_v58, %v1145_v55 }
 0xf57   :  { %v1152_v56 = vpop.permute.xlu0 %1151 }
 0xf58   :  { %v1154_v57 = vmul.f32 %v1152_v56, %v1145_v55 }
 0xf5a   :  { %1156 = vrot.lane.b32.xlu1 %v1154_v57, %s2018_s17 }
 0xfcc   :  { %v1157_v60 = vpop.permute.xlu1 %1156 }
 0xfcd   :  { %v1159_v61 = vadd.f32 %v1157_v60, %v1149_v59 }
 0xfcf   :  { %1979 = vtanh.f32 %v1159_v61  ;;  %v1328_v22 = vrot.slane %v1159_v61, 4 }
 0xfdc   :  { %v1980_v62 = vpop.eup %1979 }
 0xfdd   :  { %1162 = vrot.lane.b32.xlu0 %v1980_v62, %s2017_s3 }
0x104f   :  { %v1163_v63 = vpop.permute.xlu0 %1162 }
0x1050   :  { %v2369_v0 = vmul.f32 %v1163_v63, %v1145_v55 }
0x1052   :  { %v1171_v6 = vrot.slane %v2369_v0, 4 }
0x1054   :  { %1172 = vrot.lane.b32.xlu1 %v1171_v6, %s2018_s17 }
0x10c6   :  { %v1173_v11 = vpop.permute.xlu1 %1172 }
0x10c7   :  { %1892 = vmatmul.mubr.msk.f32.vlgmr.msra.gmra.mxu0 %vm151_vm6, %v1173_v11  ;;  %1903 = vmatmul.mubr.msk.f32.vlgmr.msra.gmra.mxu1 %vm151_vm6, %v1173_v11 }
0x10c8   :  { %1906 = vmatpush3.msra.mxu0 %v2144_v31  ;;  %1917 = vmatpush3.msra.mxu1 %v2068_v1  ;;  %v134_v1 = vadd.f32 %v2204_v41, %v2124_v10 }
0x10c9   :  { %1907 = vmatprep.subr.mxu0 %v2015_v3  ;;  %1918 = vmatprep.subr.mxu1 %v2015_v3 }
0x10ca   :  { %1908 = vmatpush3.msra.mxu0 %v2152_v33  ;;  %1919 = vmatpush3.msra.mxu1 %v2081_v5 }
0x10cb   :  { %1909 = vmatprep.subr.mxu0 %v2015_v3  ;;  %1920 = vmatprep.subr.mxu1 %v2015_v3 }
0x10cc   :  { %1910 = vmatpush3.msra.mxu0 %v2164_v35  ;;  %1921 = vmatpush3.msra.mxu1 %v2091_v7 }
0x10cd   :  { %1911 = vmatprep.subr.mxu0 %v2015_v3  ;;  %1922 = vmatprep.subr.mxu1 %v2015_v3 }
0x10ce   :  { %1923 = vmatpush3.msra.mxu1 %v2099_v8  ;;  %1924 = vmatprep.mubr.msk.f32.mxu1 %vm2016_vm1, %v2015_v3 }
0x10cf   :  { %1912 = vmatpush3.msra.mxu0 %v2173_v36  ;;  %1913 = vmatprep.mubr.msk.f32.mxu0 %vm2016_vm1, %v2015_v3 }
0x10d0   :  { %1927 = vmatprep.subr.mxu0 %v2015_v3 }
0x1187   :  { %v1242_v5 = vpop.f32.mrf.mxu0  ;;  %v1313_v7 = vpop.f32.mrf.mxu1 }
0x1188   :  { %v1243_v12 = vadd.f32 %v2211_v43, %v1242_v5  ;;  %v1317_v13 = vadd.f32 %v1313_v7, %v134_v1 }
0x1189   :  { %v1893_v14 = vpop.f32.mrf.mxu0  ;;  %v1904_v8 = vpop.f32.mrf.mxu1 }
0x118a   :  { %1246 = vst.msk [vmem:[%s2452_s6 + $0x14] sm:$0xf] %vm336_vm7, %v1243_v12  ;;  %v1659_v15 = vmul.f32 -1.442695, %v1317_v13 }
0x118c   :  { %1981 = vpow2.f32 %v1659_v15 }
0x1199   :  { %v1982_v16 = vpop.eup %1981 }
0x119a   :  { %v1321_v17 = vadd.f32 1.0, %v1982_v16 }
0x119c   :  { %1983 = vrcp.f32 %v1321_v17 }
0x11a9   :  { %v1984_v18 = vpop.eup %1983 }
0x11aa   :  { %v1324_v19 = vmul.f32 2.0, %v1984_v18 }
0x11ac   :  { %v1660_v10 = vadd.f32 -1.0, %v1324_v19 }
0x11ae   :  { %v1326_v41 = vsel %vm2130_vm4, %v1660_v10, %v1984_v18 }
0x11af   :  { %1332 = vrot.lane.b32.xlu0 %v1326_v41, %s2017_s3  ;;  %v1330_v24 = vmul.f32 %v1328_v22, %v1326_v41 }
0x1221   :  { %v1333_v20 = vpop.permute.xlu0 %1332 }
0x1222   :  { %v1335_v21 = vmul.f32 %v1333_v20, %v1326_v41 }
0x1224   :  { %1337 = vrot.lane.b32.xlu1 %v1335_v21, %s2018_s17 }
0x1296   :  { %v1338_v42 = vpop.permute.xlu1 %1337 }
0x1297   :  { %v1340_v9 = vadd.f32 %v1338_v42, %v1330_v24 }
0x1299   :  { %1985 = vtanh.f32 %v1340_v9  ;;  %v1509_v47 = vrot.slane %v1340_v9, 4 }
0x12a6   :  { %v1986_v25 = vpop.eup %1985 }
0x12a7   :  { %1343 = vrot.lane.b32.xlu0 %v1986_v25, %s2017_s3 }
0x1319   :  { %v1344_v26 = vpop.permute.xlu0 %1343 }
0x131a   :  { %v1346_v27 = vmul.f32 %v1344_v26, %v1326_v41 }
0x131c   :  { %1348 = vrot.lane.b32.xlu1 %v1346_v27, %s2018_s17 }
0x138e   :  { %v1349_v28 = vpop.permute.xlu1 %1348 }
0x138f   :  { %1351 = vst.msk [vmem:[#allocation2 + $0x18] sm:$0xf] %vm256_vm5, %v1349_v28  ;;  %1914 = vmatmul.mubr.msk.f32.vlgmr.msra.gmra.mxu0 %vm151_vm6, %v1349_v28  ;;  %1925 = vmatmul.mubr.msk.f32.vlgmr.msra.gmra.mxu1 %vm151_vm6, %v1349_v28 }
0x1390   :  { %1928 = vmatpush3.msra.mxu0 %v2144_v31  ;;  %1935 = vmatprep.mubr.msk.f32.mxu0 %vm2016_vm1, %v2015_v3 }
0x1391   :  { %1929 = vmatprep.subr.mxu0 %v2015_v3 }
0x1392   :  { %1930 = vmatpush3.msra.mxu0 %v2152_v33 }
0x1393   :  { %1931 = vmatprep.subr.mxu0 %v2015_v3 }
0x1394   :  { %1932 = vmatpush3.msra.mxu0 %v2164_v35 }
0x1395   :  { %1933 = vmatprep.subr.mxu0 %v2015_v3 }
0x1396   :  { %1934 = vmatpush3.msra.mxu0 %v2173_v36 }
0x144f   :  { %v1420_v29 = vpop.f32.mrf.mxu0  ;;  %v1491_v30 = vpop.f32.mrf.mxu1 }
0x1450   :  { %v1421_v32 = vadd.f32 %v2211_v43, %v1420_v29  ;;  %v1496_v31 = vrot.slane %v1491_v30, 4 }
0x1451   :  { %v1915_v34 = vpop.f32.mrf.mxu0  ;;  %v1926_v37 = vpop.f32.mrf.mxu1 }
0x1452   :  { %1424 = vst.msk [vmem:[%s2452_s6 + $0x18] sm:$0xf] %vm336_vm7, %v1421_v32  ;;  %v1498_v33 = vadd.f32 %v1496_v31, %v134_v1 }
0x1454   :  { %v1663_v38 = vmul.f32 -1.442695, %v1498_v33 }
0x1456   :  { %1987 = vpow2.f32 %v1663_v38 }
0x1463   :  { %v1988_v35 = vpop.eup %1987 }
0x1464   :  { %v1502_v39 = vadd.f32 1.0, %v1988_v35 }
0x1466   :  { %1989 = vrcp.f32 %v1502_v39 }
0x1473   :  { %v1990_v3 = vpop.eup %1989 }
0x1474   :  { %v1505_v36 = vmul.f32 2.0, %v1990_v3 }
0x1476   :  { %v1664_v40 = vadd.f32 -1.0, %v1505_v36 }
0x1478   :  { %v1507_v44 = vsel %vm2130_vm4, %v1664_v40, %v1990_v3 }
0x1479   :  { %1513 = vrot.lane.b32.xlu0 %v1507_v44, %s2017_s3  ;;  %v1511_v48 = vmul.f32 %v1509_v47, %v1507_v44 }
0x14eb   :  { %v1514_v45 = vpop.permute.xlu0 %1513 }
0x14ec   :  { %v1516_v46 = vmul.f32 %v1514_v45, %v1507_v44 }
0x14ee   :  { %1518 = vrot.lane.b32.xlu1 %v1516_v46, %s2018_s17 }
0x1560   :  { %v1519_v49 = vpop.permute.xlu1 %1518 }
0x1561   :  { %v1521_v50 = vadd.f32 %v1519_v49, %v1511_v48 }
0x1563   :  { %1991 = vtanh.f32 %v1521_v50 }
0x1570   :  { %v1992_v51 = vpop.eup %1991 }
0x1571   :  { %1524 = vrot.lane.b32.xlu0 %v1992_v51, %s2017_s3  ;;  %s2019_s3 = smov [#allocation2]  }
0x1572   :  { %s1616_s19 = sshll.u32 %s2019_s3, 4  ;;  %s1617_s19 = int_to_ptr.vmem [resolvable:$true] %s1616_s19 }
0x1573   :  { %s1993_s20 = scalar_lea.vmem %s1617_s19, 512  ;;  %p1998_p1 = scmp.lt.s32.totalorder %s1617_s19, %s1617_s19 }
0x1574   :  { %p1994_p0 = scmp.ne.s32.totalorder %s1617_s19, %s1993_s20  ;;  %p1999_p2 = scmp.lt.s32.totalorder %s1993_s20, %s1993_s20 }
0x1575   :  { %442 = vrot.lane.b32.xlu0 %v2225_v4, %s2018_s17 }
0x1576   :  { %p2000_p3 = por %p1999_p2, %p1998_p1 }
0x1578   :  { %p2001_p4 = pnand %p2000_p3, %p1994_p0 }
0x1579   :  { %1167 = vrot.lane.b32.xlu0 %v2369_v0, %s2018_s17 }
0x15e3   :  { %v1525_v23 = vpop.permute.xlu0 %1524 }
0x15e4   :  { %v1527_v52 = vmul.f32 %v1525_v23, %v1507_v44 }
0x15e6   :  { %v1533_v53 = vrot.slane %v1527_v52, 4 }
0x15e7   :  { %v443_v54 = vpop.permute.xlu0 %442 }
0x15e8   :  { %446 = vst.msk [vmem:[#allocation2] sm:$0xf0] %vm445_vm8, %v443_v54  ;;  %1534 = vrot.lane.b32.xlu1 %v1533_v53, %s2018_s17 }
0x15eb   :  { %v1168_v55 = vpop.permute.xlu0 %1167 }
0x15ec   :  { %1170 = vst.msk [vmem:[#allocation2 + $0x10] sm:$0xf0] %vm445_vm8, %v1168_v55  ;;  %805 = vrot.lane.b32.xlu1 %v2297_v2, %s2018_s17 }
0x15f0   :  { %1529 = vrot.lane.b32.xlu1 %v1527_v52, %s2018_s17 }
0x165a   :  { %v1535_v56 = vpop.permute.xlu1 %1534 }
0x165b   :  { %1936 = vmatmul.mubr.msk.f32.vlgmr.msra.gmra.mxu0 %vm151_vm6, %v1535_v56 }
0x165e   :  { %v806_v4 = vpop.permute.xlu1 %805 }
0x165f   :  { %808 = vst.msk [vmem:[#allocation2 + $0x8] sm:$0xf0] %vm445_vm8, %v806_v4 }
0x1662   :  { %v1530_v57 = vpop.permute.xlu1 %1529 }
0x1663   :  { %1532 = vst.msk [vmem:[#allocation2 + $0x18] sm:$0xf0] %vm445_vm8, %v1530_v57 }
0x1664   :  { %2004 = shalt.err (!%p2001_p4)
}
0x1665   :  { %s2020_s21 = smov 128   ;;  %s2021_s22 = smov 8  }
0x1666   :  { %1622 = dma.vmem_to_hbm [thread:$0]  %s1617_s19, 512, %s2453_s7, [#allocation3], %s2020_s21, %s2020_s21, %s2021_s22  }
0x171b   :  { %v1604_v2 = vpop.f32.mrf.mxu0 }
0x171c   :  { %v1605_v58 = vadd.f32 %v2211_v43, %v1604_v2 }
0x171d   :  { %v1937_v59 = vpop.f32.mrf.mxu0 }
0x171e   :  { %1608 = vst.msk [vmem:[%s2452_s6 + $0x1c] sm:$0xf] %vm336_vm7, %v1605_v58 }
0x171f   :  { %2013 = dma.done.wait [#allocation3], 512  }
0x1720   :  { %2014 = vsyncadd [#allocation3], 4294966784 }
0x1721   :  { %1628 = vsyncpa [#allocation3], 1 }

</bundles_post_ra>
